<compile_context>
chip_gen: v7x
topology: tpu7x:2x2x1
jax: 0.10.0
libtpu: 0.0.40
codegen_flags: <defaults>
</compile_context>

<pallas_src>
import functools

import jax
import jax.numpy as jnp
from jax.experimental import pallas as pl
from jax.experimental.pallas import tpu as pltpu


def _ietoken_kernel(x1_ref, x2_ref, w1_ref, w2_ref, b_ref, lab_ref,
                    preds_ref, partial_ref, *, n_total, tn):
    i = pl.program_id(0)

    # logits = [x1 | x2] @ W + b as two MXU matmuls against the two block-rows
    # of the weight (the concat is never materialized).  bf16 in, f32 accum.
    logits = (
        jnp.dot(x1_ref[...], w1_ref[...], preferred_element_type=jnp.float32)
        + jnp.dot(x2_ref[...], w2_ref[...], preferred_element_type=jnp.float32)
        + b_ref[...].astype(jnp.float32))                      # [TN, Cp] f32

    TN, Cp = logits.shape

    # Labels arrive lane-major (1, TN); one XLU relayout gives the per-row
    # column used by the CE math.
    lab_row = lab_ref[...]                                     # [1, TN] i32
    lab_col = lab_row.reshape(TN, 1)                           # [TN, 1] i32

    # valid = real token (inside N; last tile may be padded) AND label >= 0
    row = jax.lax.broadcasted_iota(jnp.int32, (TN, 1), 0) + i * tn
    not_ignored = lab_col >= 0
    valid = not_ignored & (row < n_total)                      # [TN, 1] bool
    safe_lab = jnp.where(valid, lab_col, 0)

    col = jax.lax.broadcasted_iota(jnp.int32, (TN, Cp), 1)     # [TN, Cp]

    # numerically-stable log-softmax cross entropy per token
    mx = jnp.max(logits, axis=-1, keepdims=True)               # [TN, 1]
    lse = jnp.log(jnp.sum(jnp.exp(logits - mx), axis=-1, keepdims=True)) + mx
    picked = jnp.sum(jnp.where(col == safe_lab, logits, 0.0),
                     axis=-1, keepdims=True)                   # [TN, 1]
    ce = lse - picked                                          # [TN, 1]

    # `where` (not *) so inf/nan from garbage padded rows cannot leak in.
    sum_ce = jnp.sum(jnp.where(valid, ce, 0.0))
    count = jnp.sum(valid.astype(jnp.float32))

    # per-tile partials packed into an aligned (8, 128) tile:
    # [0, 0] = sum of masked CE, [0, 1] = valid-token count, rest zeros.
    pr = jax.lax.broadcasted_iota(jnp.int32, (8, 128), 0)
    pc = jax.lax.broadcasted_iota(jnp.int32, (8, 128), 1)
    partial_ref[...] = jnp.where(
        (pr == 0) & (pc == 0), sum_ce,
        jnp.where((pr == 0) & (pc == 1), count, 0.0))

    # argmax over classes (first index on ties, matching torch), reusing mx.
    # Padded classes sit at exactly -1e30 so they can never win.
    idx = jnp.where(logits == mx, col, jnp.int32(Cp))
    preds_col = jnp.min(idx, axis=-1, keepdims=True)           # [TN, 1] i32
    preds_row = preds_col.reshape(1, TN)                       # lane-major

    # preds[labels < 0] = labels[labels < 0]; store is full-lane (1, TN).
    preds_ref[...] = jnp.where(lab_row >= 0, preds_row, lab_row)


def ietoken_forward(last_hidden, hidden_m3, labels, weight, bias, *,
                    tn=2048, compute_dtype=jnp.bfloat16):
    """last_hidden, hidden_m3: [B, S, H]; labels: [B, S] int;
    weight: [2H, C]; bias: [C]. Returns dict(loss, prediction, label)."""
    B, S, H = last_hidden.shape
    D, C = weight.shape
    assert D == 2 * H
    N = B * S

    tn = min(tn, N)
    if tn < N:
        tn = max(8, (tn // 8) * 8)         # keep the activation block 8-aligned
    num_tiles = pl.cdiv(N, tn)

    # ---- layout / dtype glue (cheap relative to the kernel's HBM traffic) ----
    # activations & weights in bf16: halves the HBM bytes the kernel reads.
    x1 = last_hidden.reshape(N, H).astype(compute_dtype)
    x2 = hidden_m3.reshape(N, H).astype(compute_dtype)

    # pad nclass up to a lane-full multiple of 128 (zero weights, -1e30 bias).
    C_pad = 128 * pl.cdiv(C, 128)
    w_use = weight.astype(compute_dtype)
    b_use = bias.astype(jnp.float32)
    if C_pad != C:
        w_use = jnp.zeros((D, C_pad), compute_dtype).at[:, :C].set(w_use)
        b_use = jnp.full((C_pad,), -1e30, jnp.float32).at[:C].set(b_use)
    b2d = b_use.reshape(1, C_pad)

    # labels lane-major: (num_tiles, tn), padded tail filled with -1 (ignored).
    lab_flat = labels.reshape(N).astype(jnp.int32)
    pad = num_tiles * tn - N
    if pad:
        lab_flat = jnp.pad(lab_flat, (0, pad), constant_values=-1)
    lab2d = lab_flat.reshape(num_tiles, tn)

    kernel = functools.partial(_ietoken_kernel, n_total=N, tn=tn)

    preds, partials = pl.pallas_call(
        kernel,
        grid=(num_tiles,),
        in_specs=[
            pl.BlockSpec((tn, H), lambda i: (i, 0)),       # x1 tile (bf16)
            pl.BlockSpec((tn, H), lambda i: (i, 0)),       # x2 tile (bf16)
            pl.BlockSpec((H, C_pad), lambda i: (0, 0)),    # W block-row 0
            pl.BlockSpec((H, C_pad), lambda i: (1, 0)),    # W block-row 1
            pl.BlockSpec((1, C_pad), lambda i: (0, 0)),    # bias (f32)
            pl.BlockSpec((1, tn), lambda i: (i, 0)),       # labels, lane-dense
        ],
        out_specs=[
            pl.BlockSpec((1, tn), lambda i: (i, 0)),       # preds, lane-dense
            pl.BlockSpec((8, 128), lambda i: (i, 0)),      # per-tile partials
        ],
        out_shape=[
            jax.ShapeDtypeStruct((num_tiles, tn), jnp.int32),
            jax.ShapeDtypeStruct((num_tiles * 8, 128), jnp.float32),
        ],
        compiler_params=pltpu.CompilerParams(
            dimension_semantics=("parallel",),             # megacore-shardable
            vmem_limit_bytes=48 * 1024 * 1024,             # v7x-safe headroom
        ),
    )(x1, x2, w_use, w_use, b2d, lab2d)

    total = jnp.sum(partials[:, 0])
    cnt = jnp.sum(partials[:, 1])
    loss = total / jnp.maximum(cnt, 1.0)   # guard all-ignored batch (0, not NaN)

    # drop the padded tail rows (they were written, but are masked to -1 /
    # garbage and never belong to a real token).
    preds_flat = preds.reshape(num_tiles * tn)[:N]

    return {
        "loss": loss,
        "prediction": preds_flat.reshape(B, S),
        "label": labels.astype(jnp.int32),
    }


if __name__ == "__main__":
    # small shapes consistent with the forward: batch=2, seq=8, per-stream
    # hidden=16 (concatenated feature dim 32 plays the role of 2048), nclass=8
    B, S, H, C = 2, 8, 16, 8
    key = jax.random.PRNGKey(0)
    k1, k2, k3, k4, k5 = jax.random.split(key, 5)

    last_hidden = jax.random.normal(k1, (B, S, H), dtype=jnp.float32)
    hidden_m3 = jax.random.normal(k2, (B, S, H), dtype=jnp.float32)

    # deterministic "Linear(2048, nclass)" params
    weight = (jax.random.normal(k3, (2 * H, C), dtype=jnp.float32)
              / jnp.sqrt(2.0 * H))
    bias = jax.random.normal(k4, (C,), dtype=jnp.float32) * 0.01

    # labels with some ignored (-100) positions, as in token classification
    labels = jax.random.randint(k5, (B, S), 0, C, dtype=jnp.int32)
    labels = labels.at[:, 0].set(-100)   # [CLS]-style ignored tokens
    labels = labels.at[1, S - 1].set(-100)

    out = ietoken_forward(last_hidden, hidden_m3, labels, weight, bias)
    jax.block_until_ready(out)

    # reference check in plain JAX, using the same bf16-fed / f32-accum matmul
    # the kernel performs so the comparison is apples-to-apples.
    x1b = last_hidden.reshape(-1, H).astype(jnp.bfloat16)
    x2b = hidden_m3.reshape(-1, H).astype(jnp.bfloat16)
    wb = weight.astype(jnp.bfloat16)
    logits = (jnp.dot(x1b, wb[:H], preferred_element_type=jnp.float32)
              + jnp.dot(x2b, wb[H:], preferred_element_type=jnp.float32)
              + bias)
    lab = labels.reshape(-1)
    m = lab >= 0
    lse = jax.nn.logsumexp(logits, axis=-1)
    picked = jnp.take_along_axis(
        logits, jnp.where(m, lab, 0)[:, None], axis=-1)[:, 0]
    ref_loss = jnp.sum(jnp.where(m, lse - picked, 0.0)) / jnp.sum(m)
    ref_preds = jnp.where(m, jnp.argmax(logits, axis=-1).astype(jnp.int32), lab)

    assert jnp.allclose(out["loss"], ref_loss, rtol=1e-5, atol=1e-5), (
        out["loss"], ref_loss)
    assert jnp.array_equal(out["prediction"].reshape(-1), ref_preds)
    print("KERNEL_OK")
</pallas_src>

<mosaic_0001>
module attributes {stable_mosaic.version = 11 : i64} {
  func.func @_ietoken_kernel(%arg0: i32, %arg1: memref<16x16xbf16, #tpu.memory_space<vmem>>, %arg2: memref<16x16xbf16, #tpu.memory_space<vmem>>, %arg3: memref<16x128xbf16, #tpu.memory_space<vmem>>, %arg4: memref<16x128xbf16, #tpu.memory_space<vmem>>, %arg5: memref<1x128xf32, #tpu.memory_space<vmem>>, %arg6: memref<1x16xi32, #tpu.memory_space<vmem>>, %arg7: memref<1x16xi32, #tpu.memory_space<vmem>>, %arg8: memref<8x128xf32, #tpu.memory_space<vmem>>) attributes {dimension_semantics = [#tpu.dimension_semantics<parallel>], iteration_bounds = array<i64: 1>, scalar_prefetch = 0 : i64, scratch_operands = 0 : i64, tpu.core_type = #tpu.core_type<tc>, window_params = [{transform_indices = @transform_0, window_bounds = array<i64: 16, 16>}, {transform_indices = @transform_1, window_bounds = array<i64: 16, 16>}, {transform_indices = @transform_2, window_bounds = array<i64: 16, 128>}, {transform_indices = @transform_3, window_bounds = array<i64: 16, 128>}, {pipeline_mode = #tpu.pipeline_mode<synchronous>, transform_indices = @transform_4, window_bounds = array<i64: 1, 128>}, {transform_indices = @transform_5, window_bounds = array<i64: 1, 16>}, {transform_indices = @transform_6, window_bounds = array<i64: 1, 16>}, {transform_indices = @transform_7, window_bounds = array<i64: 8, 128>}]} {
    %c0 = arith.constant 0 : index
    %c0_0 = arith.constant 0 : index
    %0 = vector.load %arg1[%c0, %c0_0] : memref<16x16xbf16, #tpu.memory_space<vmem>>, vector<16x16xbf16>
    %c0_1 = arith.constant 0 : index
    %c0_2 = arith.constant 0 : index
    %1 = vector.load %arg3[%c0_1, %c0_2] : memref<16x128xbf16, #tpu.memory_space<vmem>>, vector<16x128xbf16>
    %cst = arith.constant dense<0.000000e+00> : vector<16x128xf32>
    %2 = tpu.matmul %0, %1, %cst {dimension_numbers = #tpu.dot_dimension_numbers<[1], [0], [0], [1], [0, 0, 1, 1], [], []>} : vector<16x16xbf16>, vector<16x128xbf16>, vector<16x128xf32> -> vector<16x128xf32>
    %c0_3 = arith.constant 0 : index
    %c0_4 = arith.constant 0 : index
    %3 = vector.load %arg2[%c0_3, %c0_4] : memref<16x16xbf16, #tpu.memory_space<vmem>>, vector<16x16xbf16>
    %c0_5 = arith.constant 0 : index
    %c0_6 = arith.constant 0 : index
    %4 = vector.load %arg4[%c0_5, %c0_6] : memref<16x128xbf16, #tpu.memory_space<vmem>>, vector<16x128xbf16>
    %cst_7 = arith.constant dense<0.000000e+00> : vector<16x128xf32>
    %5 = tpu.matmul %3, %4, %cst_7 {dimension_numbers = #tpu.dot_dimension_numbers<[1], [0], [0], [1], [0, 0, 1, 1], [], []>} : vector<16x16xbf16>, vector<16x128xbf16>, vector<16x128xf32> -> vector<16x128xf32>
    %6 = arith.addf %2, %5 : vector<16x128xf32>
    %c0_8 = arith.constant 0 : index
    %c0_9 = arith.constant 0 : index
    %7 = vector.load %arg5[%c0_8, %c0_9] : memref<1x128xf32, #tpu.memory_space<vmem>>, vector<1x128xf32>
    %8 = vector.broadcast %7 : vector<1x128xf32> to vector<16x128xf32>
    %9 = arith.addf %6, %8 : vector<16x128xf32>
    %c0_10 = arith.constant 0 : index
    %c0_11 = arith.constant 0 : index
    %10 = vector.load %arg6[%c0_10, %c0_11] : memref<1x16xi32, #tpu.memory_space<vmem>>, vector<1x16xi32>
    %11 = vector.shape_cast %10 : vector<1x16xi32> to vector<16x1xi32>
    %12 = tpu.iota {dimensions = array<i32: 0>} : vector<16x1xi32>
    %c16_i32 = arith.constant 16 : i32
    %13 = arith.muli %arg0, %c16_i32 : i32
    %14 = vector.broadcast %13 : i32 to vector<16x1xi32>
    %15 = arith.addi %12, %14 : vector<16x1xi32>
    %c0_i32 = arith.constant 0 : i32
    %16 = vector.broadcast %c0_i32 : i32 to vector<16x1xi32>
    %17 = arith.cmpi sge, %11, %16 : vector<16x1xi32>
    %c16_i32_12 = arith.constant 16 : i32
    %18 = vector.broadcast %c16_i32_12 : i32 to vector<16x1xi32>
    %19 = arith.cmpi slt, %15, %18 : vector<16x1xi32>
    %20 = arith.andi %17, %19 : vector<16x1xi1>
    %c0_i32_13 = arith.constant 0 : i32
    %21 = vector.broadcast %c0_i32_13 : i32 to vector<16x1xi32>
    %22 = arith.select %20, %11, %21 : vector<16x1xi1>, vector<16x1xi32>
    %23 = tpu.iota {dimensions = array<i32: 1>} : vector<16x128xi32>
    %cst_14 = arith.constant dense<0xFF800000> : vector<16xf32>
    %24 = vector.multi_reduction <maximumf>, %9, %cst_14 [1] : vector<16x128xf32> to vector<16xf32>
    %25 = vector.shape_cast %24 : vector<16xf32> to vector<16x1xf32>
    %26 = vector.broadcast %25 : vector<16x1xf32> to vector<16x128xf32>
    %27 = arith.subf %9, %26 : vector<16x128xf32>
    %28 = math.exp %27 : vector<16x128xf32>
    %cst_15 = arith.constant dense<0.000000e+00> : vector<16xf32>
    %29 = vector.multi_reduction <add>, %28, %cst_15 [1] : vector<16x128xf32> to vector<16xf32>
    %30 = vector.shape_cast %29 : vector<16xf32> to vector<16x1xf32>
    %31 = math.log %30 : vector<16x1xf32>
    %32 = arith.addf %31, %25 : vector<16x1xf32>
    %33 = vector.broadcast %22 : vector<16x1xi32> to vector<16x128xi32>
    %34 = arith.cmpi eq, %23, %33 : vector<16x128xi32>
    %cst_16 = arith.constant 0.000000e+00 : f32
    %35 = vector.broadcast %cst_16 : f32 to vector<16x128xf32>
    %36 = arith.select %34, %9, %35 : vector<16x128xi1>, vector<16x128xf32>
    %cst_17 = arith.constant dense<0.000000e+00> : vector<16xf32>
    %37 = vector.multi_reduction <add>, %36, %cst_17 [1] : vector<16x128xf32> to vector<16xf32>
    %38 = vector.shape_cast %37 : vector<16xf32> to vector<16x1xf32>
    %39 = arith.subf %32, %38 : vector<16x1xf32>
    %cst_18 = arith.constant 0.000000e+00 : f32
    %40 = vector.broadcast %cst_18 : f32 to vector<16x1xf32>
    %41 = arith.select %20, %39, %40 : vector<16x1xi1>, vector<16x1xf32>
    %42 = vector.shape_cast %41 : vector<16x1xf32> to vector<1x16x1xf32>
    %cst_19 = arith.constant dense<0.000000e+00> : vector<1xf32>
    %43 = vector.multi_reduction <add>, %42, %cst_19 [1, 2] : vector<1x16x1xf32> to vector<1xf32>
    %44 = vector.shape_cast %43 : vector<1xf32> to vector<1x1x1xf32>
    %45 = vector.extract %44[0, 0, 0] : f32 from vector<1x1x1xf32>
    %46 = arith.extui %20 : vector<16x1xi1> to vector<16x1xi32>
    %47 = arith.sitofp %46 : vector<16x1xi32> to vector<16x1xf32>
    %48 = vector.shape_cast %47 : vector<16x1xf32> to vector<1x16x1xf32>
    %cst_20 = arith.constant dense<0.000000e+00> : vector<1xf32>
    %49 = vector.multi_reduction <add>, %48, %cst_20 [1, 2] : vector<1x16x1xf32> to vector<1xf32>
    %50 = vector.shape_cast %49 : vector<1xf32> to vector<1x1x1xf32>
    %51 = vector.extract %50[0, 0, 0] : f32 from vector<1x1x1xf32>
    %52 = tpu.iota {dimensions = array<i32: 0>} : vector<8x128xi32>
    %53 = tpu.iota {dimensions = array<i32: 1>} : vector<8x128xi32>
    %c0_i32_21 = arith.constant 0 : i32
    %54 = vector.broadcast %c0_i32_21 : i32 to vector<8x128xi32>
    %55 = arith.cmpi eq, %52, %54 : vector<8x128xi32>
    %c0_i32_22 = arith.constant 0 : i32
    %56 = vector.broadcast %c0_i32_22 : i32 to vector<8x128xi32>
    %57 = arith.cmpi eq, %53, %56 : vector<8x128xi32>
    %58 = arith.andi %55, %57 : vector<8x128xi1>
    %c0_i32_23 = arith.constant 0 : i32
    %59 = vector.broadcast %c0_i32_23 : i32 to vector<8x128xi32>
    %60 = arith.cmpi eq, %52, %59 : vector<8x128xi32>
    %c1_i32 = arith.constant 1 : i32
    %61 = vector.broadcast %c1_i32 : i32 to vector<8x128xi32>
    %62 = arith.cmpi eq, %53, %61 : vector<8x128xi32>
    %63 = arith.andi %60, %62 : vector<8x128xi1>
    %cst_24 = arith.constant 0.000000e+00 : f32
    %64 = vector.broadcast %51 : f32 to vector<8x128xf32>
    %65 = vector.broadcast %cst_24 : f32 to vector<8x128xf32>
    %66 = arith.select %63, %64, %65 : vector<8x128xi1>, vector<8x128xf32>
    %67 = vector.broadcast %45 : f32 to vector<8x128xf32>
    %68 = arith.select %58, %67, %66 : vector<8x128xi1>, vector<8x128xf32>
    %c0_25 = arith.constant 0 : index
    %c0_26 = arith.constant 0 : index
    %69 = vector.load %arg8[%c0_25, %c0_26] : memref<8x128xf32, #tpu.memory_space<vmem>>, vector<8x128xf32>
    tpu.vector_store %arg8[%c0_25, %c0_26], %68 {strides = array<i32>} : memref<8x128xf32, #tpu.memory_space<vmem>>, vector<8x128xf32>,
    %70 = vector.broadcast %25 : vector<16x1xf32> to vector<16x128xf32>
    %71 = arith.cmpf oeq, %9, %70 : vector<16x128xf32>
    %c128_i32 = arith.constant 128 : i32
    %72 = vector.broadcast %c128_i32 : i32 to vector<16x128xi32>
    %73 = arith.select %71, %23, %72 : vector<16x128xi1>, vector<16x128xi32>
    %cst_27 = arith.constant dense<2147483647> : vector<16xi32>
    %74 = vector.multi_reduction <minsi>, %73, %cst_27 [1] : vector<16x128xi32> to vector<16xi32>
    %75 = vector.shape_cast %74 : vector<16xi32> to vector<16x1xi32>
    %76 = vector.shape_cast %75 : vector<16x1xi32> to vector<1x16xi32>
    %c0_i32_28 = arith.constant 0 : i32
    %77 = vector.broadcast %c0_i32_28 : i32 to vector<1x16xi32>
    %78 = arith.cmpi sge, %10, %77 : vector<1x16xi32>
    %79 = arith.select %78, %76, %10 : vector<1x16xi1>, vector<1x16xi32>
    %c0_29 = arith.constant 0 : index
    %c0_30 = arith.constant 0 : index
    %80 = vector.load %arg7[%c0_29, %c0_30] : memref<1x16xi32, #tpu.memory_space<vmem>>, vector<1x16xi32>
    tpu.vector_store %arg7[%c0_29, %c0_30], %79 {strides = array<i32>} : memref<1x16xi32, #tpu.memory_space<vmem>>, vector<1x16xi32>,
    return
  }
  func.func @transform_0(%arg0: i32) -> (i32, i32) {
    %c0_i32 = arith.constant 0 : i32
    %c0_i32_0 = arith.constant 0 : i32
    return %arg0, %c0_i32 : i32, i32
  }
  func.func @transform_1(%arg0: i32) -> (i32, i32) {
    %c0_i32 = arith.constant 0 : i32
    %c0_i32_0 = arith.constant 0 : i32
    return %arg0, %c0_i32 : i32, i32
  }
  func.func @transform_2(%arg0: i32) -> (i32, i32) {
    %c0_i32 = arith.constant 0 : i32
    %c0_i32_0 = arith.constant 0 : i32
    %c0_i32_1 = arith.constant 0 : i32
    return %c0_i32, %c0_i32_0 : i32, i32
  }
  func.func @transform_3(%arg0: i32) -> (i32, i32) {
    %c1_i32 = arith.constant 1 : i32
    %c0_i32 = arith.constant 0 : i32
    %c0_i32_0 = arith.constant 0 : i32
    return %c1_i32, %c0_i32 : i32, i32
  }
  func.func @transform_4(%arg0: i32) -> (i32, i32) {
    %c0_i32 = arith.constant 0 : i32
    %c0_i32_0 = arith.constant 0 : i32
    %c0_i32_1 = arith.constant 0 : i32
    return %c0_i32, %c0_i32_0 : i32, i32
  }
  func.func @transform_5(%arg0: i32) -> (i32, i32) {
    %c0_i32 = arith.constant 0 : i32
    %c0_i32_0 = arith.constant 0 : i32
    return %arg0, %c0_i32 : i32, i32
  }
  func.func @transform_6(%arg0: i32) -> (i32, i32) {
    %c0_i32 = arith.constant 0 : i32
    %c0_i32_0 = arith.constant 0 : i32
    return %arg0, %c0_i32 : i32, i32
  }
  func.func @transform_7(%arg0: i32) -> (i32, i32) {
    %c0_i32 = arith.constant 0 : i32
    %c0_i32_0 = arith.constant 0 : i32
    return %arg0, %c0_i32 : i32, i32
  }
}

</mosaic_0001>

<bundles_post_ra>
// kernel: tpu_custom_call.1
= control target key start
LH: loop header
LB: loop body
LE: loop exit
PB: predicated region body
PF: predicated region fallthrough
CT: control target
= control target key end

     0   :  { %13 = vsyncpa [#allocation3], 0  ;;  %s989_s0 = inlined_call_operand.hbm [shape: bf16[16,16], index: 0, kind: input, shape index: {}]   ;;  %s990_s1 = inlined_call_operand.hbm [shape: bf16[16,16], index: 1, kind: input, shape index: {}]   ;;  %s991_s2 = inlined_call_operand.hbm [shape: bf16[32,128], index: 2, kind: input, shape index: {}]   ;;  %s992_s3 = inlined_call_operand.hbm [shape: bf16[32,128], index: 3, kind: input, shape index: {}]   ;;  %s993_s4 = inlined_call_operand.vmem [shape: f32[1,128], index: 4, kind: input, shape index: {}]   ;;  %s994_s5 = inlined_call_operand.vmem [shape: s32[1,16], index: 5, kind: input, shape index: {}]   ;;  %s995_s6 = inlined_call_operand.hbm [shape: s32[1,16], index: 6, kind: output, shape index: {0}]   ;;  %s996_s7 = inlined_call_operand.hbm [shape: f32[8,128], index: 7, kind: output, shape index: {1}]  }
   0x1   :  { %14 = vsyncpa [#allocation6], 0 }
   0x2   :  { %15 = vsyncpa [#allocation9], 0 }
   0x3   :  { %16 = vsyncpa [#allocation4], 0 }
   0x4   :  { %17 = vsyncpa [#allocation12], 0  ;;  %s772_s24 = smov [#allocation5]   ;;  %s773_s26 = smov [#allocation2]  }
   0x5   :  { %s35_s25 = sshll.u32 %s772_s24, 4  ;;  %s23_s27 = sshll.u32 %s773_s26, 4  ;;  %s36_s25 = int_to_ptr.vmem [resolvable:$true] %s35_s25  ;;  %s824_s27 = int_to_ptr.vmem [resolvable:$true] %s23_s27 }
   0x6   :  { %s627_s30 = scalar_lea.hbm %s990_s1, 128 }
   0x7   :  { %p628_p0 = scmp.ne.s32.totalorder %s990_s1, %s627_s30  ;;  %p631_p1 = scmp.lt.u32.totalorder %s627_s30, %s990_s1 }
   0x9   :  { %p633_p2 = pnand %p631_p1, %p628_p0 }
   0xb   :  { %636 = shalt.err (!%p633_p2)
}
   0xc   :  { %s637_s12 = scalar_lea.vmem %s36_s25, 128  ;;  %p642_p4 = scmp.lt.s32.totalorder %s36_s25, %s36_s25 }
   0xd   :  { %p638_p3 = scmp.ne.s32.totalorder %s36_s25, %s637_s12  ;;  %p643_p5 = scmp.lt.s32.totalorder %s637_s12, %s637_s12 }
   0xf   :  { %p644_p6 = por %p643_p5, %p642_p4 }
  0x11   :  { %p645_p7 = pnand %p644_p6, %p638_p3 }
  0x13   :  { %648 = shalt.err (!%p645_p7)
}
  0x14   :  { %s774_s13 = smov 64   ;;  %s775_s14 = smov 4  }
  0x15   :  { %41 = dma.hbm_to_vmem [thread:$0]  %s990_s1, 128, %s36_s25, [#allocation6], %s774_s13, %s774_s13, %s775_s14  }
  0x16   :  { %s649_s19 = scalar_lea.hbm %s989_s0, 128 }
  0x17   :  { %p650_p8 = scmp.ne.s32.totalorder %s989_s0, %s649_s19  ;;  %p653_p9 = scmp.lt.u32.totalorder %s649_s19, %s989_s0 }
  0x19   :  { %p655_p10 = pnand %p653_p9, %p650_p8 }
  0x1b   :  { %658 = shalt.err (!%p655_p10)
}
  0x1c   :  { %s659_s24 = scalar_lea.vmem %s824_s27, 128  ;;  %p664_p12 = scmp.lt.s32.totalorder %s824_s27, %s824_s27 }
  0x1d   :  { %p660_p11 = scmp.ne.s32.totalorder %s824_s27, %s659_s24  ;;  %p665_p13 = scmp.lt.s32.totalorder %s659_s24, %s659_s24 }
  0x1f   :  { %p666_p0 = por %p665_p13, %p664_p12 }
  0x21   :  { %p667_p1 = pnand %p666_p0, %p660_p11 }
  0x23   :  { %670 = shalt.err (!%p667_p1)
}
  0x24   :  { %29 = dma.hbm_to_vmem [thread:$0]  %s989_s0, 128, %s824_s27, [#allocation3], %s774_s13, %s774_s13, %s775_s14  }
  0x25   :  { %s864_s29 = scalar_lea.hbm %s992_s3, 128  ;;  %s776_s30 = smov [#allocation7]  }
  0x26   :  { %s47_s8 = sshll.u32 %s776_s30, 4  ;;  %s777_s9 = smov [#allocation8]   ;;  %s48_s8 = int_to_ptr.vmem [resolvable:$true] %s47_s8 }
  0x27   :  { %s60_s10 = sshll.u32 %s777_s9, 4  ;;  %s671_s15 = scalar_lea.hbm %s991_s2, 128  ;;  %s61_s10 = int_to_ptr.vmem [resolvable:$true] %s60_s10 }
  0x28   :  { %p672_p2 = scmp.ne.s32.totalorder %s991_s2, %s671_s15  ;;  %s673_s27 = scalar_lea.hbm %s991_s2, 256 }
  0x29   :  { %p674_p3 = scmp.lt.u32.totalorder %s673_s27, %s671_s15  ;;  %p675_p4 = scmp.lt.u32.totalorder %s671_s15, %s991_s2 }
  0x2b   :  { %p676_p5 = por %p675_p4, %p674_p3 }
  0x2d   :  { %p677_p6 = pnand %p676_p5, %p672_p2 }
  0x2f   :  { %680 = shalt.err (!%p677_p6)
}
  0x30   :  { %s681_s21 = scalar_lea.vmem %s48_s8, 128  ;;  %p686_p8 = scmp.lt.s32.totalorder %s48_s8, %s48_s8 }
  0x31   :  { %p682_p7 = scmp.ne.s32.totalorder %s48_s8, %s681_s21  ;;  %p687_p9 = scmp.lt.s32.totalorder %s681_s21, %s681_s21 }
  0x33   :  { %p688_p10 = por %p687_p9, %p686_p8 }
  0x35   :  { %p689_p11 = pnand %p688_p10, %p682_p7 }
  0x37   :  { %692 = shalt.err (!%p689_p11)
}
  0x38   :  { %53 = dma.hbm_to_vmem [thread:$0]  %s991_s2, 128, %s48_s8, [#allocation6], %s774_s13, %s774_s13, %s775_s14  }
  0x39   :  { %s717_s25 = scalar_lea.hbm %s992_s3, 256  ;;  %p696_p13 = scmp.lt.u32.totalorder %s864_s29, %s992_s3 }
  0x3a   :  { %p694_p12 = scmp.ne.s32.totalorder %s864_s29, %s717_s25  ;;  %p697_p0 = scmp.lt.u32.totalorder %s717_s25, %s717_s25 }
  0x3b   :  { %p699_p2 = scmp.lt.u32.totalorder %s717_s25, %s864_s29 }
  0x3c   :  { %p698_p1 = por %p697_p0, %p696_p13 }
  0x3e   :  { %p700_p3 = por %p699_p2, %p698_p1 }
  0x40   :  { %p701_p4 = pnand %p700_p3, %p694_p12 }
  0x42   :  { %704 = shalt.err (!%p701_p4)
}
  0x43   :  { %s705_s30 = scalar_lea.vmem %s61_s10, 128  ;;  %p710_p6 = scmp.lt.s32.totalorder %s61_s10, %s61_s10 }
  0x44   :  { %p706_p5 = scmp.ne.s32.totalorder %s61_s10, %s705_s30  ;;  %p711_p7 = scmp.lt.s32.totalorder %s705_s30, %s705_s30 }
  0x46   :  { %p712_p8 = por %p711_p7, %p710_p6 }
  0x48   :  { %p713_p9 = pnand %p712_p8, %p706_p5 }
  0x4a   :  { %716 = shalt.err (!%p713_p9)
}
  0x4b   :  { %66 = dma.hbm_to_vmem [thread:$0]  %s864_s29, 128, %s61_s10, [#allocation9], %s774_s13, %s774_s13, %s775_s14  }
  0x4c   :  { %762 = dma.done.wait [#allocation3], 128  }
  0x4d   :  { %763 = vsyncadd [#allocation3], 4294967168 }
  0x4e   :  { %764 = dma.done.wait [#allocation6], 256  }
  0x4f   :  { %765 = vsyncadd [#allocation6], 4294967040 }
  0x50   :  { %766 = dma.done.wait [#allocation9], 128  }
  0x51   :  { %767 = vsyncadd [#allocation9], 4294967168  ;;  %v213_v0 = vlaneseq  ;;  %v778_v1 = vmov 0.0   ;;  %vm779_vm0 = vmmov 0   ;;  %v615_v3 = vld [vmem:[#allocation8] sm:$0xff]   ;;  %v616_v4 = vld [vmem:[#allocation7] sm:$0xff]  }
  0x52   :  { %585 = vmatprep.subr.bf16.mxu0 %v778_v1  ;;  %591 = vmatprep.subr.bf16.mxu1 %v778_v1  ;;  %v617_v6 = vld [vmem:[#allocation5] sm:$0xff]   ;;  %vm103_vm1 = vcmask 130048   ;;  %v618_v7 = vld [vmem:[#allocation2] sm:$0xff]   ;;  %v780_v59 = vmov 0   ;;  %vm273_vm10 = vcmask 7168  }
  0x53   :  { %587 = vmatprep.mubr.msk.bf16.mxu0 %vm779_vm0, %v778_v1  ;;  %593 = vmatprep.mubr.msk.bf16.mxu1 %vm779_vm0, %v778_v1  ;;  %v901_v2 = vshrl.u32 %v213_v0, 7  ;;  %v909_v8 = vld [vmem:[%s994_s5] sm:$0x1]  ;;  %v916_v24 = vand.u32 127, %v213_v0  ;;  %s782_s5 = smov [#allocation11]  }
  0x54   :  { %586 = vmatpush3.bf16.msra.mxu0 %v615_v3  ;;  %592 = vmatpush3.bf16.msra.mxu1 %v616_v4  ;;  %v578_v12 = vld [vmem:[%s993_s4] ss:$0 sm:$0xff]  ;;  %s557_s29 = sshll.u32 %s782_s5, 4  ;;  %s558_s29 = int_to_ptr.vmem [resolvable:$true] %s557_s29 }
  0x55   :  { %v904_v5 = vsub.s32 0, %v901_v2  ;;  %613 = vset.pattern.permute.xlu0 %v780_v59  ;;  %614 = vset.pattern.permute.xlu1 %v780_v59  ;;  %vm302_vm11 = vcmp.eq.s32.totalorder %v901_v2, 0  ;;  %vm305_vm12 = vcmp.eq.s32.totalorder %v916_v24, 1  ;;  %vm303_vm13 = vcmp.eq.s32.totalorder %v916_v24, 0  ;;  %s718_s9 = scalar_lea.vmem %s558_s29, 128  ;;  %p723_p11 = scmp.lt.s32.totalorder %s558_s29, %s558_s29 }
  0x56   :  { %vm306_vm14 = vmand %vm302_vm11, %vm305_vm12  ;;  %p719_p10 = scmp.ne.s32.totalorder %s558_s29, %s718_s9  ;;  %p724_p12 = scmp.lt.s32.totalorder %s718_s9, %s718_s9 }
  0x57   :  { %588 = vmatmul.mubr.msk.bf16.vlgmr.msra.gmra.mrb[0].mxu0 %vm103_vm1, %v617_v6  ;;  %v216_v9 = vrot.slane %v909_v8, %v904_v5  ;;  %594 = vmatmul.mubr.msk.bf16.vlgmr.msra.gmra.mrb[0].mxu1 %vm103_vm1, %v618_v7  ;;  %vm304_vm15 = vmand %vm302_vm11, %vm303_vm13 }
  0x58   :  { %p725_p13 = por %p724_p12, %p723_p11 }
  0x59   :  { %218 = vbcast.lane.b32.xlu1 %v216_v9, 256 }
  0x5a   :  { %p726_p0 = pnand %p725_p13, %p719_p10 }
  0x5d   :  { %222 = vbcast.lane.b32.xlu1 %v216_v9, 264 }
  0xcb   :  { %v219_v35 = vpop.permute.xlu1 %218 }
  0xcc   :  { %vm231_vm4 = vcmp.ge.s32.totalorder %v219_v35, 0 }
  0xcd   :  { %v237_v39 = vsel %vm231_vm4, %v219_v35, 0  ;;  %v579_v6 = vsel %vm231_vm4, 1.0, %v778_v1 }
  0xce   :  { %vm261_vm6 = vcmp.eq.s32.totalorder %v916_v24, %v237_v39 }
  0xcf   :  { %v223_v38 = vpop.permute.xlu1 %222 }
  0xd0   :  { %vm232_vm5 = vcmp.ge.s32.totalorder %v223_v38, 0 }
  0xd1   :  { %v238_v41 = vsel %vm232_vm5, %v223_v38, 0  ;;  %v580_v7 = vsel %vm232_vm5, 1.0, %v778_v1  ;;  %v355_v1 = vsub.s32 2, %v901_v2 }
  0xd2   :  { %vm262_vm7 = vcmp.eq.s32.totalorder %v916_v24, %v238_v41 }
 0x12a   :  { %v141_v10 = vpop.f32.mrb[0].mxu0  ;;  %v196_v11 = vpop.f32.mrb[0].mxu1 }
 0x12b   :  { %v589_v13 = vpop.f32.mrb[1].mxu0  ;;  %v197_v14 = vadd.f32 %v196_v11, %v141_v10  ;;  %v595_v15 = vpop.f32.mrb[1].mxu1 }
 0x12c   :  { %v144_v16 = vpop.f32.mrb[2].mxu0  ;;  %v199_v17 = vpop.f32.mrb[2].mxu1  ;;  %v291_v13 = vsel %vm273_vm10, %v580_v7, 0.0  ;;  %v781_v15 = vmov 1966171168  }
 0x12d   :  { %v590_v18 = vpop.f32.mrb[3].mxu0  ;;  %v210_v19 = vadd.f32 %v578_v12, %v197_v14  ;;  %v200_v20 = vadd.f32 %v199_v17, %v144_v16  ;;  %v596_v21 = vpop.f32.mrb[3].mxu1  ;;  %v414_v16 = vunpack.c.l.s4 %v781_v15 }
 0x12f   :  { %241 = vmax.xlane.f32.xlu0 %v210_v19  ;;  %v211_v22 = vadd.f32 %v578_v12, %v200_v20  ;;  %v263_v42 = vsel %vm261_vm6, %v210_v19, 0.0  ;;  %v290_v12 = vsel %vm273_vm10, %v579_v6, 0.0  ;;  %v415_v20 = vunpack.c.0.s8 %v414_v16 }
 0x130   :  { %v292_v14 = vadd.f32 %v291_v13, %v290_v12 }
 0x131   :  { %v264_v43 = vsel %vm262_vm7, %v211_v22, 0.0 }
 0x133   :  { %243 = vmax.xlane.f32.xlu0 %v211_v22 }
 0x1bc   :  { %v242_v23 = vpop.xlane.xlu0 %241 }
 0x1bd   :  { %v245_v25 = vsub.f32 %v210_v19, %v242_v23  ;;  %vm312_vm2 = vcmp.eq.f32.partialorder %v210_v19, %v242_v23 }
 0x1be   :  { %v314_v26 = vsel %vm312_vm2, %v916_v24, 128 }
 0x1bf   :  { %v247_v27 = vmul.f32 1.442695, %v245_v25  ;;  %v317_v28 = vshra.s32 %v314_v26, 16  ;;  %v316_v44 = vand.u32 65535, %v314_v26  ;;  %v359_v25 = vsub.s32 3, %v901_v2 }
 0x1c0   :  { %v244_v29 = vpop.xlane.xlu0 %243  ;;  %v363_v26 = vsub.s32 4, %v901_v2 }
 0x1c1   :  { %619 = vpow2.f32 %v247_v27  ;;  %v246_v30 = vsub.f32 %v211_v22, %v244_v29  ;;  %vm313_vm3 = vcmp.eq.f32.partialorder %v211_v22, %v244_v29  ;;  %v319_v31 = vcvt.s32.f32 %v317_v28 }
 0x1c2   :  { %v315_v32 = vsel %vm313_vm3, %v916_v24, 128  ;;  %v318_v46 = vcvt.s32.f32 %v316_v44  ;;  %v367_v27 = vsub.s32 5, %v901_v2  ;;  %v371_v28 = vsub.s32 6, %v901_v2 }
 0x1c3   :  { %v249_v33 = vmul.f32 1.442695, %v246_v30  ;;  %320 = vmin.xlane.f32.xlu0 %v319_v31  ;;  %v331_v34 = vshra.s32 %v315_v32, 16  ;;  %v330_v47 = vand.u32 65535, %v315_v32  ;;  %v375_v30 = vsub.s32 7, %v901_v2 }
 0x1c5   :  { %621 = vpow2.f32 %v249_v33  ;;  %v333_v36 = vcvt.s32.f32 %v331_v34  ;;  %v332_v50 = vcvt.s32.f32 %v330_v47  ;;  %v938_v33 = vsub.s32 %v415_v20, %v901_v2 }
 0x1c7   :  { %334 = vmin.xlane.f32.xlu1 %v333_v36 }
 0x1cb   :  { %v620_v37 = vpop.eup %619 }
 0x1cc   :  { %251 = vadd.xlane.f32.xlu0 %v620_v37 }
 0x1cf   :  { %v622_v40 = vpop.eup %621 }
 0x1d0   :  { %253 = vadd.xlane.f32.xlu0 %v622_v40 }
 0x1d4   :  { %265 = vadd.xlane.f32.xlu0 %v263_v42 }
 0x1d8   :  { %267 = vadd.xlane.f32.xlu0 %v264_v43 }
 0x250   :  { %v321_v45 = vpop.xlane.xlu0 %320 }
 0x251   :  { %vm322_vm8 = vcmp.eq.f32.partialorder %v319_v31, %v321_v45  ;;  %v327_v17 = vcvt.f32.s32 %v321_v45 }
 0x252   :  { %v323_v48 = vsel %vm322_vm8, %v318_v46, inf }
 0x253   :  { %324 = vmin.xlane.f32.xlu0 %v323_v48  ;;  %v328_v21 = vshll.u32 %v327_v17, 16 }
 0x254   :  { %v335_v49 = vpop.xlane.xlu1 %334 }
 0x255   :  { %vm336_vm9 = vcmp.eq.f32.partialorder %v333_v36, %v335_v49  ;;  %v341_v18 = vcvt.f32.s32 %v335_v49 }
 0x256   :  { %v337_v51 = vsel %vm336_vm9, %v332_v50, inf }
 0x257   :  { %338 = vmin.xlane.f32.xlu0 %v337_v51  ;;  %v342_v31 = vshll.u32 %v341_v18, 16 }
 0x259   :  { %v252_v52 = vpop.xlane.xlu0 %251 }
 0x25a   :  { %623 = vlog2.f32 %v252_v52 }
 0x25d   :  { %v254_v53 = vpop.xlane.xlu0 %253 }
 0x25e   :  { %625 = vlog2.f32 %v254_v53 }
 0x261   :  { %v266_v56 = vpop.xlane.xlu0 %265 }
 0x264   :  { %v624_v54 = vpop.eup %623 }
 0x265   :  { %v256_v55 = vmul.f32 0.6931472, %v624_v54  ;;  %v268_v63 = vpop.xlane.xlu0 %267 }
 0x267   :  { %v259_v57 = vadd.f32 %v256_v55, %v242_v23  ;;  %v351_v23 = vsub.s32 1, %v901_v2 }
 0x268   :  { %v626_v58 = vpop.eup %625 }
 0x269   :  { %v258_v60 = vmul.f32 0.6931472, %v626_v58  ;;  %v269_v61 = vsub.f32 %v259_v57, %v266_v56 }
 0x26b   :  { %v260_v62 = vadd.f32 %v258_v60, %v244_v29  ;;  %v271_v0 = vsel %vm231_vm4, %v269_v61, 0.0 }
 0x26c   :  { %v274_v9 = vsel %vm273_vm10, %v271_v0, 0.0 }
 0x26d   :  { %v270_v3 = vsub.f32 %v260_v62, %v268_v63 }
 0x26f   :  { %v272_v4 = vsel %vm232_vm5, %v270_v3, 0.0 }
 0x270   :  { %v275_v10 = vsel %vm273_vm10, %v272_v4, 0.0 }
 0x271   :  { %v276_v11 = vadd.f32 %v275_v10, %v274_v9 }
 0x273   :  { %277 = vadd.xlane.f32.xlu0 %v276_v11 }
 0x277   :  { %293 = vadd.xlane.f32.xlu0 %v292_v14 }
 0x2e0   :  { %v325_v19 = vpop.xlane.xlu0 %324 }
 0x2e1   :  { %v326_v22 = vcvt.f32.s32 %v325_v19 }
 0x2e3   :  { %v329_v29 = vadd.s32 %v328_v21, %v326_v22 }
 0x2e4   :  { %v339_v32 = vpop.xlane.xlu0 %338 }
 0x2e5   :  { %v340_v34 = vcvt.f32.s32 %v339_v32  ;;  %v348_v35 = vrot.slane %v329_v29, %v904_v5  ;;  %v352_v36 = vrot.slane %v329_v29, %v351_v23  ;;  %v356_v37 = vrot.slane %v329_v29, %v355_v1 }
 0x2e6   :  { %v360_v38 = vrot.slane %v329_v29, %v359_v25  ;;  %v364_v39 = vrot.slane %v329_v29, %v363_v26  ;;  %v368_v40 = vrot.slane %v329_v29, %v367_v27  ;;  %v372_v41 = vrot.slane %v329_v29, %v371_v28 }
 0x2e7   :  { %v343_v42 = vadd.s32 %v342_v31, %v340_v34  ;;  %v376_v43 = vrot.slane %v329_v29, %v375_v30  ;;  %v409_v44 = vcombine.low %v348_v35, %v352_v36 }
 0x2e8   :  { %v410_v45 = vcombine.low %v356_v37, %v360_v38  ;;  %v411_v46 = vcombine.low %v364_v39, %v368_v40 }
 0x2e9   :  { %v412_v47 = vcombine.low %v372_v41, %v376_v43  ;;  %v419_v48 = vrot.slane %v409_v44, %v938_v33  ;;  %v380_v49 = vrot.slane %v343_v42, %v904_v5  ;;  %v384_v50 = vrot.slane %v343_v42, %v351_v23 }
 0x2ea   :  { %v426_v51 = vrot.slane %v410_v45, %v938_v33  ;;  %v433_v52 = vrot.slane %v411_v46, %v938_v33  ;;  %v388_v53 = vrot.slane %v343_v42, %v355_v1  ;;  %v392_v54 = vrot.slane %v343_v42, %v359_v25 }
 0x2eb   :  { %v440_v55 = vrot.slane %v412_v47, %v938_v33  ;;  %v396_v56 = vrot.slane %v343_v42, %v363_v26  ;;  %v400_v57 = vrot.slane %v343_v42, %v367_v27  ;;  %v404_v58 = vrot.slane %v343_v42, %v371_v28 }
 0x2ec   :  { %v441_v59 = vcombine.low %v419_v48, %v426_v51  ;;  %v408_v60 = vrot.slane %v343_v42, %v375_v30  ;;  %v458_v61 = vcombine.low %v380_v49, %v384_v50  ;;  %v459_v62 = vcombine.low %v388_v53, %v392_v54 }
 0x2ed   :  { %v442_v63 = vcombine.low %v433_v52, %v440_v55  ;;  %v460_v0 = vcombine.low %v396_v56, %v400_v57 }
 0x2ee   :  { %v449_v5 = vrot.slane %v441_v59, %v938_v33  ;;  %v461_v3 = vcombine.low %v404_v58, %v408_v60  ;;  %v468_v4 = vrot.slane %v458_v61, %v938_v33  ;;  %v475_v6 = vrot.slane %v459_v62, %v938_v33 }
 0x2ef   :  { %v456_v7 = vrot.slane %v442_v63, %v938_v33  ;;  %v482_v9 = vrot.slane %v460_v0, %v938_v33 }
 0x2f0   :  { %v489_v10 = vrot.slane %v461_v3, %v938_v33  ;;  %v490_v11 = vcombine.low %v468_v4, %v475_v6 }
 0x2f1   :  { %v457_v12 = vcombine.low %v449_v5, %v456_v7 }
 0x2f2   :  { %v491_v13 = vcombine.low %v482_v9, %v489_v10  ;;  %v498_v14 = vrot.slane %v490_v11, %v938_v33 }
 0x2f3   :  { %508 = vperm.xlu0 %613, %v457_v12  }
 0x2f4   :  { %v505_v15 = vrot.slane %v491_v13, %v938_v33 }
 0x2f6   :  { %v506_v16 = vcombine.low %v498_v14, %v505_v15 }
 0x2f8   :  { %511 = vperm.xlu1 %614, %v506_v16  }
 0x300   :  { %v278_v17 = vpop.xlane.xlu0 %277 }
 0x301   :  { %v279_v18 = vrot.slane %v278_v17, 4 }
 0x303   :  { %v280_v19 = vadd.f32 %v279_v18, %v278_v17 }
 0x304   :  { %v294_v20 = vpop.xlane.xlu0 %293 }
 0x305   :  { %v281_v21 = vrot.slane %v280_v19, 2  ;;  %v295_v22 = vrot.slane %v294_v20, 4 }
 0x307   :  { %v296_v23 = vadd.f32 %v295_v22, %v294_v20  ;;  %v282_v1 = vadd.f32 %v281_v21, %v280_v19 }
 0x309   :  { %v297_v25 = vrot.slane %v296_v23, 2  ;;  %v283_v26 = vrot.slane %v282_v1, 1 }
 0x30b   :  { %v284_v27 = vadd.f32 %v283_v26, %v282_v1  ;;  %v298_v28 = vadd.f32 %v297_v25, %v296_v23 }
 0x30d   :  { %597 = vpush %v284_v27  ;;  %v299_v29 = vrot.slane %v298_v28, 1 }
 0x30f   :  { %v300_v30 = vadd.f32 %v299_v29, %v298_v28 }
 0x311   :  { %599 = vpush %v300_v30 }
 0x33e   :  { %s598_s4 = spop %597 }
 0x33f   :  { %v309_v32 = vstv %s598_s4 }
 0x342   :  { %s600_s8 = spop %599 }
 0x343   :  { %v307_v31 = vstv %s600_s8 }
 0x344   :  { %v308_v34 = vsel %vm306_vm14, %v307_v31, 0.0 }
 0x345   :  { %v310_v35 = vsel %vm304_vm15, %v309_v32, %v308_v34 }
 0x346   :  { %311 = vst [vmem:[#allocation11] sm:$0xff] %v310_v35 }
 0x347   :  { %729 = shalt.err (!%p726_p0)
}
 0x348   :  { %s730_s12 = scalar_lea.hbm %s996_s7, 128 }
 0x349   :  { %p731_p1 = scmp.ne.s32.totalorder %s996_s7, %s730_s12  ;;  %p734_p2 = scmp.lt.u32.totalorder %s730_s12, %s996_s7 }
 0x34b   :  { %p736_p3 = pnand %p734_p2, %p731_p1 }
 0x34d   :  { %739 = shalt.err (!%p736_p3)
}
 0x34e   :  { %560 = dma.vmem_to_hbm [thread:$0]  %s558_s29, 128, %s996_s7, [#allocation12]   ;;  %v517_v36 = vadd.s32 4294967288, %v916_v24  ;;  %v515_v37 = vsub.s32 %v916_v24, %v901_v2  ;;  %vm522_vm0 = vcmask 130112   ;;  %vm344_vm1 = vcmp.ge.s32.totalorder %v909_v8, 0 }
 0x34f   :  { %s783_s19 = smov [#allocation10]   ;;  %vm539_vm2 = vcmask 122880  }
 0x350   :  { %v520_v38 = vsub.s32 %v517_v36, %v901_v2  ;;  %s547_s20 = sshll.u32 %s783_s19, 4  ;;  %s548_s20 = int_to_ptr.vmem [resolvable:$true] %s547_s20 }
 0x351   :  { %s740_s7 = scalar_lea.vmem %s548_s20, 16  ;;  %s744_s21 = scalar_lea.vmem %s548_s20, 32 }
 0x352   :  { %p741_p4 = scmp.ne.s32.totalorder %s548_s20, %s740_s7  ;;  %p745_p5 = scmp.lt.s32.totalorder %s548_s20, %s548_s20 }
 0x353   :  { %p746_p6 = scmp.lt.s32.totalorder %s744_s21, %s740_s7 }
 0x355   :  { %p747_p7 = por %p746_p6, %p745_p5 }
 0x357   :  { %p748_p8 = pnand %p747_p7, %p741_p4 }
 0x372   :  { %v509_v39 = vpop.permute.xlu0 %508 }
 0x373   :  { %v516_v41 = vrot.slane %v509_v39, %v515_v37 }
 0x377   :  { %v512_v40 = vpop.permute.xlu1 %511 }
 0x378   :  { %v521_v42 = vrot.slane %v512_v40, %v520_v38 }
 0x37a   :  { %v523_v43 = vsel %vm522_vm0, %v521_v42, %v516_v41 }
 0x37b   :  { %v530_v44 = vrot.slane %v523_v43, %v938_v33 }
 0x37d   :  { %v537_v45 = vrot.slane %v530_v44, %v938_v33 }
 0x37f   :  { %v538_v24 = vsel %vm344_vm1, %v537_v45, %v909_v8 }
 0x380   :  { %540 = vst.msk [vmem:[#allocation10] sm:$0x1] %vm539_vm2, %v538_v24 }
 0x381   :  { %751 = shalt.err (!%p748_p8)
}
 0x382   :  { %s752_s24 = scalar_lea.hbm %s995_s6, 16 }
 0x383   :  { %p753_p9 = scmp.ne.s32.totalorder %s995_s6, %s752_s24  ;;  %p756_p10 = scmp.lt.u32.totalorder %s752_s24, %s995_s6 }
 0x385   :  { %p758_p11 = pnand %p756_p10, %p753_p9 }
 0x387   :  { %761 = shalt.err (!%p758_p11)
}
 0x388   :  { %550 = dma.vmem_to_hbm [thread:$0]  %s548_s20, 16, %s995_s6, [#allocation4]  }
 0x389   :  { %768 = dma.done.wait [#allocation4], 16  }
 0x38a   :  { %769 = vsyncadd [#allocation4], 4294967280 }
 0x38b   :  { %770 = dma.done.wait [#allocation12], 128  }
 0x38c   :  { %771 = vsyncadd [#allocation12], 4294967168 }
 0x38d   :  { %567 = vsyncpa [#allocation3], 1 }
 0x38e   :  { %568 = vsyncpa [#allocation6], 1 }
 0x38f   :  { %569 = vsyncpa [#allocation9], 1 }
 0x390   :  { %570 = vsyncpa [#allocation4], 1 }
 0x391   :  { %571 = vsyncpa [#allocation12], 1 }

</bundles_post_ra>
